<compile_context>
chip_gen: v6e
topology: v6e:2x2x1
jax: 0.10.0
libtpu: 0.0.40
codegen_flags: <defaults>
</compile_context>

<pallas_src>
import functools

import jax
import jax.numpy as jnp
from jax.experimental import pallas as pl
from jax.experimental.pallas import tpu as pltpu


def _round_up(a, b):
    return ((a + b - 1) // b) * b


def _int_pow(v, n):
    """v**n for static non-negative integer n via repeated multiplies (VPU only)."""
    if n == 0:
        return jnp.ones_like(v)
    acc = None
    base = v
    while n > 0:
        if n & 1:
            acc = base if acc is None else acc * base
        n >>= 1
        if n:
            base = base * base
    return acc


def _row_granule(dtype):
    """Min sublane multiple for a packed dtype: f32->8, bf16->16, int8/bool->32."""
    return 8 * max(1, 4 // jnp.dtype(dtype).itemsize)


def _focal_loss_kernel(x_ref, t_ref, part_ref, *, alpha0, alpha1, gamma,
                       apply_sigmoid, rows_per_block, chunk, num_blocks,
                       full_rows, rem_lanes, needs_mask, has_dup):
    p_idx = pl.program_id(0)          # parallel split (megacore on v7x)
    j = pl.program_id(1)              # reduction axis
    nj = pl.num_programs(1)
    b = p_idx * nj + j                # logical block id (>= num_blocks => duplicate)

    @pl.when(j == 0)
    def _init():
        part_ref[...] = jnp.zeros_like(part_ref)

    # Row offset (in the global (R,128) slab) of the block actually loaded
    # (duplicated iterations are clamped to the last real block by the index_map).
    blk = jnp.minimum(b, num_blocks - 1) if has_dup else b
    block_row0 = blk * rows_per_block

    g = float(gamma)
    g_is_int = g.is_integer() and 0 <= g <= 16

    def chunk_sum(r0, rows, masked):
        """(rows,128) slice -> signed partial sums reduced to (8,128) (VPU only)."""
        x = x_ref[pl.ds(r0, rows), :].astype(jnp.float32)
        t_pos = t_ref[pl.ds(r0, rows), :] != 0        # binary target, native dtype

        if apply_sigmoid:
            # p = sigmoid(x); both clamped logs from one softplus:
            #   log p     = -log(1 + e^-x)
            #   log (1-p) = -x - log(1 + e^-x)
            e = jnp.exp(-x)
            one_plus_e = 1.0 + e
            lp = -jnp.log(one_plus_e)
            log_p = jnp.maximum(lp, -100.0)
            log_1mp = jnp.maximum(lp - x, -100.0)
            p = 1.0 / one_plus_e                       # exact: feeds p**gamma
        else:
            p = x
            log_p = jnp.maximum(jnp.log(p), -100.0)
            log_1mp = jnp.maximum(jnp.log(1.0 - p), -100.0)

        if g_is_int:
            pg = _int_pow(p, int(g))                   # p**gamma (VPU multiplies)
            qg = _int_pow(1.0 - p, int(g))             # (1-p)**gamma
        else:
            # Reuses the clamped logs (p==0 gives exp(-100g) ~ 0, negligible
            # deviation from torch's exact 0).
            pg = jnp.exp(g * log_p)
            qg = jnp.exp(g * log_1mp)

        # Binary target select instead of the arithmetic blend:
        #   t==1: alpha1*(1-p)^g * (-log p),  t==0: alpha0*p^g * (-log(1-p)).
        # Sign is folded: we accumulate the NEGATED sums and negate once in
        # the wrapper.
        neg_loss = jnp.where(t_pos, (alpha1 * qg) * log_p, (alpha0 * pg) * log_1mp)

        if masked:
            # Row-wise comparison (no flat index -> no int32 overflow).
            row = jax.lax.broadcasted_iota(jnp.int32, (rows, 128), 0)
            grow = block_row0 + r0 + row
            m = grow < full_rows
            if rem_lanes:
                lane = jax.lax.broadcasted_iota(jnp.int32, (rows, 128), 1)
                m = jnp.logical_or(m, jnp.logical_and(grow == full_rows,
                                                      lane < rem_lanes))
            if has_dup:
                m = jnp.logical_and(m, b < num_blocks)
            neg_loss = jnp.where(m, neg_loss, 0.0)

        # Sublane-resident partial sums: pure VPU adds; the single cross-lane
        # reduce happens once in the wrapper.
        return jnp.sum(neg_loss.reshape(-1, 8, 128), axis=0)

    def block_sum(masked):
        n_full = rows_per_block // chunk
        tail = rows_per_block % chunk
        acc = jnp.zeros((8, 128), jnp.float32)
        if n_full > 0:
            def body(c, a):
                r0 = pl.multiple_of(c * chunk, chunk)
                return a + chunk_sum(r0, chunk, masked)
            # fori_loop (not unrolled) bounds live f32 temporaries to one
            # chunk's worth independent of the DMA tile size.
            acc = jax.lax.fori_loop(0, n_full, body, acc)
        if tail:
            acc = acc + chunk_sum(n_full * chunk, tail, masked)
        return acc

    if needs_mask or has_dup:
        fast_last = num_blocks - 1 if needs_mask else num_blocks
        if fast_last > 0:
            @pl.when(b < fast_last)
            def _fast():                               # mask-free common path
                part_ref[...] += block_sum(False)[None, :, :]

            @pl.when(b >= fast_last)
            def _boundary():                           # boundary / duplicate block
                part_ref[...] += block_sum(True)[None, :, :]
        else:
            part_ref[...] += block_sum(True)[None, :, :]
    else:
        part_ref[...] += block_sum(False)[None, :, :]


def focal_loss(x, target, alpha=(1.0, 1.0), gamma=2.0, from_logits=None):
    """x: (N, 1, H, W) float, target: (N, H, W) binary (any dtype). Scalar f32.

    from_logits: None -> replicate torch's data-dependent `input.min() < 0`
    test (costs one extra HBM read of x); True/False -> skip the min pass.
    """
    N, C, H, W = x.shape
    assert C == 1
    assert target.shape == (N, H, W)

    total = N * H * W
    TR_MAX = 4096        # rows per block: 2 MiB f32 per input block
    CHUNK = 512          # inner sub-chunk rows: bounds live temporaries

    x_flat = x.reshape(-1)
    t_flat = target.reshape(-1)          # keep producer dtype (bool/u8/f32 ...)

    # Lane-dense (R, 128) slab.  A physical pad (HBM copy) only happens for
    # 128-unaligned or tiny inputs; typical shapes take the zero-copy path.
    granule = max(_row_granule(x.dtype), _row_granule(target.dtype))
    padded = max(_round_up(total, 128), granule * 128)
    if padded != total:
        extra = padded - total
        x_flat = jnp.pad(x_flat, (0, extra))
        t_flat = jnp.pad(t_flat, (0, extra))
    R = padded // 128
    x2d = x_flat.reshape(R, 128)
    t2d = t_flat.reshape(R, 128)

    # Row tiling: blocks <= TR_MAX rows, balanced so the boundary block wastes
    # at most ~granule rows of masked compute.  Block rows are a multiple of
    # the dtype sublane granule (or equal the full dim).
    if R <= TR_MAX and R % 8 == 0:
        tr = R
    else:
        nb_target = pl.cdiv(R, TR_MAX)
        tr = min(_round_up(pl.cdiv(R, nb_target), granule), (R // granule) * granule)
    num_blocks = pl.cdiv(R, tr)

    # Parallel split across TensorCores (2x on v7x, near no-op on 1-TC chips).
    # Odd block counts would need one duplicated (fully masked) block; only
    # accept that waste when it is small relative to the total work.
    if num_blocks >= 2 and (num_blocks % 2 == 0 or num_blocks >= 16):
        P = 2
    else:
        P = 1
    J = pl.cdiv(num_blocks, P)
    has_dup = (P * J != num_blocks)
    needs_mask = (num_blocks * tr * 128 != total)

    if has_dup:
        idx_map = lambda p, j: (jnp.minimum(p * J + j, num_blocks - 1), 0)
    else:
        idx_map = lambda p, j: (p * J + j, 0)

    def run(apply_sigmoid):
        kernel = functools.partial(
            _focal_loss_kernel,
            alpha0=float(alpha[0]), alpha1=float(alpha[1]), gamma=float(gamma),
            apply_sigmoid=apply_sigmoid, rows_per_block=tr, chunk=CHUNK,
            num_blocks=num_blocks, full_rows=total // 128,
            rem_lanes=total % 128, needs_mask=needs_mask, has_dup=has_dup)
        n_trans = (3 if apply_sigmoid else 2) + (0 if float(gamma).is_integer() else 2)
        cost = pl.CostEstimate(
            flops=20 * padded,
            transcendentals=n_trans * padded,
            bytes_accessed=int(x2d.size * x2d.dtype.itemsize
                               + t2d.size * t2d.dtype.itemsize
                               + P * 8 * 128 * 4))
        return pl.pallas_call(
            kernel,
            out_shape=jax.ShapeDtypeStruct((P, 8, 128), jnp.float32),
            grid=(P, J),
            in_specs=[pl.BlockSpec((tr, 128), idx_map),
                      pl.BlockSpec((tr, 128), idx_map)],
            out_specs=pl.BlockSpec((1, 8, 128), lambda p, j: (p, 0, 0)),
            compiler_params=pltpu.CompilerParams(
                dimension_semantics=("parallel", "arbitrary"),
                vmem_limit_bytes=32 * 1024 * 1024),
            cost_estimate=cost,
        )(x2d, t2d)

    if from_logits is None:
        # torch-compatible data-dependent decision (extra HBM read of x).
        partials = jax.lax.cond(jnp.min(x) < 0,
                                lambda: run(True),
                                lambda: run(False))
    else:
        partials = run(bool(from_logits))

    # Kernel accumulates alpha * pow * log terms (<= 0); negate once here.
    return -jnp.sum(partials) / jnp.float32(total)


def focal_loss_ref(x, target, alpha=(1.0, 1.0), gamma=2.0):
    """Pure-JAX reference mirroring the PyTorch forward."""
    p = jnp.where(jnp.min(x) < 0, jax.nn.sigmoid(x), x)
    p = jnp.squeeze(p, axis=1)
    t = target.astype(jnp.float32)
    log_p = jnp.maximum(jnp.log(p), -100.0)
    log_1mp = jnp.maximum(jnp.log(1.0 - p), -100.0)
    bce = -(t * log_p + (1.0 - t) * log_1mp)
    neg = alpha[0] * jnp.power(p, gamma) * (1.0 - t) * bce
    pos = alpha[1] * jnp.power(1.0 - p, gamma) * t * bce
    return jnp.mean(pos + neg)


if __name__ == "__main__":
    key = jax.random.PRNGKey(0)
    k1, k2, k3, k4 = jax.random.split(key, 4)

    # Case 1: logit inputs (min < 0), float32 binary target; explicit
    # from_logits avoids the extra jnp.min pass.
    x1 = jax.random.normal(k1, (2, 1, 16, 16), dtype=jnp.float32)
    t1 = (jax.random.uniform(k2, (2, 16, 16)) > 0.5).astype(jnp.float32)
    out1 = focal_loss(x1, t1, from_logits=True)
    ref1 = focal_loss_ref(x1, t1)
    assert jnp.allclose(out1, ref1, rtol=2e-5, atol=2e-6), (out1, ref1)

    # Same inputs through the torch-compatible data-dependent path (lax.cond).
    out1b = focal_loss(x1, t1)
    assert jnp.allclose(out1b, ref1, rtol=2e-5, atol=2e-6), (out1b, ref1)

    # Case 2: probability inputs (min >= 0), narrow uint8 target, non-default
    # alpha/gamma, odd spatial size (exercises lane-tail masking).
    x2 = jax.random.uniform(k3, (2, 1, 15, 15), dtype=jnp.float32,
                            minval=0.05, maxval=0.95)
    t2 = (jax.random.uniform(k4, (2, 15, 15)) > 0.3).astype(jnp.uint8)
    out2 = focal_loss(x2, t2, alpha=(0.25, 0.75), gamma=3.0, from_logits=False)
    ref2 = focal_loss_ref(x2, t2, alpha=(0.25, 0.75), gamma=3.0)
    assert jnp.allclose(out2, ref2, rtol=2e-5, atol=2e-6), (out2, ref2)

    jax.block_until_ready((out1, out1b, out2))
    print("KERNEL_OK")
</pallas_src>

<mosaic_0001>
module attributes {stable_mosaic.version = 11 : i64} {
  func.func @_focal_loss_kernel(%arg0: i32, %arg1: i32, %arg2: memref<8x128xf32, #tpu.memory_space<vmem>>, %arg3: memref<8x128xf32, #tpu.memory_space<vmem>>, %arg4: memref<1x8x128xf32, #tpu.memory_space<vmem>>) attributes {dimension_semantics = [#tpu.dimension_semantics<parallel>, #tpu.dimension_semantics<arbitrary>], iteration_bounds = array<i64: 1, 1>, scalar_prefetch = 0 : i64, scratch_operands = 0 : i64, tpu.core_type = #tpu.core_type<tc>, window_params = [{transform_indices = @transform_0, window_bounds = array<i64: 8, 128>}, {transform_indices = @transform_1, window_bounds = array<i64: 8, 128>}, {transform_indices = @transform_2, window_bounds = array<i64: 1, 8, 128>}]} {
    %c1_i32 = arith.constant 1 : i32
    %0 = arith.muli %arg0, %c1_i32 : i32
    %1 = arith.addi %0, %arg1 : i32
    %c0_i32 = arith.constant 0 : i32
    %2 = arith.cmpi eq, %arg1, %c0_i32 : i32
    %3 = arith.extui %2 : i1 to i32
    %c0_i32_0 = arith.constant 0 : i32
    %4 = arith.cmpi ne, %3, %c0_i32_0 : i32
    scf.if %4 {
      %cst_23 = arith.constant 0.000000e+00 : f32
      %52 = vector.broadcast %cst_23 : f32 to vector<1x8x128xf32>
      %c0_24 = arith.constant 0 : index
      %c0_25 = arith.constant 0 : index
      %c0_26 = arith.constant 0 : index
      %53 = vector.load %arg4[%c0_24, %c0_25, %c0_26] : memref<1x8x128xf32, #tpu.memory_space<vmem>>, vector<1x8x128xf32>
      tpu.vector_store %arg4[%c0_24, %c0_25, %c0_26], %52 {strides = array<i32>} : memref<1x8x128xf32, #tpu.memory_space<vmem>>, vector<1x8x128xf32>,
    } else {
    }
    %c8_i32 = arith.constant 8 : i32
    %5 = arith.muli %1, %c8_i32 : i32
    %c0 = arith.constant 0 : index
    %c0_1 = arith.constant 0 : index
    %c0_2 = arith.constant 0 : index
    %6 = vector.load %arg4[%c0, %c0_1, %c0_2] : memref<1x8x128xf32, #tpu.memory_space<vmem>>, vector<1x8x128xf32>
    %cst = arith.constant 0.000000e+00 : f32
    %7 = vector.broadcast %cst : f32 to vector<8x128xf32>
    %c0_3 = arith.constant 0 : index
    %c0_4 = arith.constant 0 : index
    %8 = vector.load %arg2[%c0_3, %c0_4] : memref<8x128xf32, #tpu.memory_space<vmem>>, vector<8x128xf32>
    %c0_5 = arith.constant 0 : index
    %c0_6 = arith.constant 0 : index
    %9 = vector.load %arg3[%c0_5, %c0_6] : memref<8x128xf32, #tpu.memory_space<vmem>>, vector<8x128xf32>
    %cst_7 = arith.constant 0.000000e+00 : f32
    %10 = vector.broadcast %cst_7 : f32 to vector<8x128xf32>
    %11 = arith.cmpf one, %9, %10 : vector<8x128xf32>
    %cst_8 = arith.constant 0.000000e+00 : f32
    %12 = vector.broadcast %cst_8 : f32 to vector<8x128xf32>
    %13 = arith.subf %12, %8 : vector<8x128xf32>
    %14 = math.exp %13 : vector<8x128xf32>
    %cst_9 = arith.constant 1.000000e+00 : f32
    %15 = vector.broadcast %cst_9 : f32 to vector<8x128xf32>
    %16 = arith.addf %15, %14 : vector<8x128xf32>
    %17 = math.log %16 : vector<8x128xf32>
    %cst_10 = arith.constant 0.000000e+00 : f32
    %18 = vector.broadcast %cst_10 : f32 to vector<8x128xf32>
    %19 = arith.subf %18, %17 : vector<8x128xf32>
    %cst_11 = arith.constant -1.000000e+02 : f32
    %20 = vector.broadcast %cst_11 : f32 to vector<8x128xf32>
    %21 = arith.maximumf %19, %20 : vector<8x128xf32>
    %22 = arith.subf %19, %8 : vector<8x128xf32>
    %cst_12 = arith.constant -1.000000e+02 : f32
    %23 = vector.broadcast %cst_12 : f32 to vector<8x128xf32>
    %24 = arith.maximumf %22, %23 : vector<8x128xf32>
    %cst_13 = arith.constant 1.000000e+00 : f32
    %25 = vector.broadcast %cst_13 : f32 to vector<8x128xf32>
    %26 = arith.divf %25, %16 : vector<8x128xf32>
    %27 = arith.mulf %26, %26 : vector<8x128xf32>
    %cst_14 = arith.constant 1.000000e+00 : f32
    %28 = vector.broadcast %cst_14 : f32 to vector<8x128xf32>
    %29 = arith.subf %28, %26 : vector<8x128xf32>
    %30 = arith.mulf %29, %29 : vector<8x128xf32>
    %cst_15 = arith.constant 1.000000e+00 : f32
    %31 = vector.broadcast %cst_15 : f32 to vector<8x128xf32>
    %32 = arith.mulf %31, %30 : vector<8x128xf32>
    %33 = arith.mulf %32, %21 : vector<8x128xf32>
    %cst_16 = arith.constant 1.000000e+00 : f32
    %34 = vector.broadcast %cst_16 : f32 to vector<8x128xf32>
    %35 = arith.mulf %34, %27 : vector<8x128xf32>
    %36 = arith.mulf %35, %24 : vector<8x128xf32>
    %37 = arith.select %11, %33, %36 : vector<8x128xi1>, vector<8x128xf32>
    %38 = tpu.iota {dimensions = array<i32: 0>} : vector<8x128xi32>
    %c0_i32_17 = arith.constant 0 : i32
    %39 = arith.addi %5, %c0_i32_17 : i32
    %40 = vector.broadcast %39 : i32 to vector<8x128xi32>
    %41 = arith.addi %40, %38 : vector<8x128xi32>
    %c4_i32 = arith.constant 4 : i32
    %42 = vector.broadcast %c4_i32 : i32 to vector<8x128xi32>
    %43 = arith.cmpi slt, %41, %42 : vector<8x128xi32>
    %cst_18 = arith.constant 0.000000e+00 : f32
    %44 = vector.broadcast %cst_18 : f32 to vector<8x128xf32>
    %45 = arith.select %43, %37, %44 : vector<8x128xi1>, vector<8x128xf32>
    %46 = vector.shape_cast %45 : vector<8x128xf32> to vector<1x8x128xf32>
    %cst_19 = arith.constant dense<0.000000e+00> : vector<8x128xf32>
    %47 = vector.multi_reduction <add>, %46, %cst_19 [0] : vector<1x8x128xf32> to vector<8x128xf32>
    %48 = arith.addf %7, %47 : vector<8x128xf32>
    %49 = vector.shape_cast %48 : vector<8x128xf32> to vector<1x8x128xf32>
    %50 = arith.addf %6, %49 : vector<1x8x128xf32>
    %c0_20 = arith.constant 0 : index
    %c0_21 = arith.constant 0 : index
    %c0_22 = arith.constant 0 : index
    %51 = vector.load %arg4[%c0_20, %c0_21, %c0_22] : memref<1x8x128xf32, #tpu.memory_space<vmem>>, vector<1x8x128xf32>
    tpu.vector_store %arg4[%c0_20, %c0_21, %c0_22], %50 {strides = array<i32>} : memref<1x8x128xf32, #tpu.memory_space<vmem>>, vector<1x8x128xf32>,
    return
  }
  func.func @transform_0(%arg0: i32, %arg1: i32) -> (i32, i32) {
    %c1_i32 = arith.constant 1 : i32
    %0 = arith.muli %arg0, %c1_i32 : i32
    %1 = arith.addi %0, %arg1 : i32
    %c0_i32 = arith.constant 0 : i32
    %c0_i32_0 = arith.constant 0 : i32
    return %1, %c0_i32 : i32, i32
  }
  func.func @transform_1(%arg0: i32, %arg1: i32) -> (i32, i32) {
    %c1_i32 = arith.constant 1 : i32
    %0 = arith.muli %arg0, %c1_i32 : i32
    %1 = arith.addi %0, %arg1 : i32
    %c0_i32 = arith.constant 0 : i32
    %c0_i32_0 = arith.constant 0 : i32
    return %1, %c0_i32 : i32, i32
  }
  func.func @transform_2(%arg0: i32, %arg1: i32) -> (i32, i32, i32) {
    %c0_i32 = arith.constant 0 : i32
    %c0_i32_0 = arith.constant 0 : i32
    %c0_i32_1 = arith.constant 0 : i32
    return %arg0, %c0_i32, %c0_i32_0 : i32, i32, i32
  }
}

</mosaic_0001>

<bundles_post_ra>
// kernel: tpu_custom_call.1
= control target key start
LH: loop header
LB: loop body
LE: loop exit
PB: predicated region body
PF: predicated region fallthrough
CT: control target
= control target key end

     0   :  { %7 = vsyncpa [#allocation3], 0  ;;  %s202_s0 = inlined_call_operand.hbm [shape: f32[8,128], index: 0, kind: input, shape index: {}]   ;;  %s203_s1 = inlined_call_operand.hbm [shape: f32[8,128], index: 1, kind: input, shape index: {}]   ;;  %s204_s2 = inlined_call_operand.hbm [shape: f32[1,8,128], index: 2, kind: output, shape index: {}]  }
   0x1   :  { %8 = vsyncpa [#allocation6], 0 }
   0x2   :  { %9 = vsyncpa [#allocation4], 0  ;;  %s175_s9 = smov [#allocation2]   ;;  %s176_s11 = smov [#allocation5]  }
   0x3   :  { %s19_s10 = sshll.u32 %s175_s9, 4  ;;  %s32_s12 = sshll.u32 %s176_s11, 4  ;;  %s20_s10 = int_to_ptr.vmem [resolvable:$true] %s19_s10  ;;  %s33_s12 = int_to_ptr.vmem [resolvable:$true] %s32_s12 }
   0x4   :  { %s117_s13 = scalar_lea.vmem %s20_s10, 128  ;;  %p122_p1 = scmp.lt.s32.totalorder %s20_s10, %s20_s10 }
   0x5   :  { %p118_p0 = scmp.ne.s32.totalorder %s20_s10, %s117_s13  ;;  %p123_p2 = scmp.lt.s32.totalorder %s117_s13, %s117_s13 }
   0x7   :  { %p124_p3 = por %p123_p2, %p122_p1 }
   0x9   :  { %p125_p4 = pnand %p124_p3, %p118_p0 }
   0xb   :  { %128 = shalt.err (!%p125_p4)
}
   0xc   :  { %22 = dma.hbm_to_vmem [thread:$0]  %s202_s0, 128, %s20_s10, [#allocation3]  }
   0xd   :  { %s137_s16 = scalar_lea.vmem %s33_s12, 128  ;;  %p142_p6 = scmp.lt.s32.totalorder %s33_s12, %s33_s12 }
   0xe   :  { %p138_p5 = scmp.ne.s32.totalorder %s33_s12, %s137_s16  ;;  %p143_p7 = scmp.lt.s32.totalorder %s137_s16, %s137_s16 }
  0x10   :  { %p144_p8 = por %p143_p7, %p142_p6 }
  0x12   :  { %p145_p9 = pnand %p144_p8, %p138_p5 }
  0x14   :  { %148 = shalt.err (!%p145_p9)
}
  0x15   :  { %35 = dma.hbm_to_vmem [thread:$0]  %s203_s1, 128, %s33_s12, [#allocation6]  }
  0x16   :  { %169 = dma.done.wait [#allocation3], 128  }
  0x17   :  { %170 = vsyncadd [#allocation3], 4294967168 }
  0x18   :  { %171 = dma.done.wait [#allocation6], 128  }
  0x19   :  { %172 = vsyncadd [#allocation6], 4294967168  ;;  %v52_v0 = vld [vmem:[#allocation2] sm:$0xff]  ;;  %v73_v8 = vlaneseq  ;;  %v53_v12 = vld [vmem:[#allocation5] sm:$0xff]  ;;  %s177_s0 = smov [#allocation7]  }
  0x1a   :  { %v55_v1 = vsub.f32 0.0, %v52_v0  ;;  %vm54_vm0 = vcmp.ne.f32.partialorder %v53_v12, 0.0  ;;  %s89_s1 = sshll.u32 %s177_s0, 4  ;;  %s90_s1 = int_to_ptr.vmem [resolvable:$true] %s89_s1 }
  0x1b   :  { %v74_v16 = vshrl.u32 %v73_v8, 7  ;;  %s149_s19 = scalar_lea.vmem %s90_s1, 128  ;;  %p154_p11 = scmp.lt.s32.totalorder %s90_s1, %s90_s1 }
  0x1c   :  { %v56_v2 = vmul.f32 1.442695, %v55_v1  ;;  %p150_p10 = scmp.ne.s32.totalorder %s90_s1, %s149_s19  ;;  %p155_p12 = scmp.lt.s32.totalorder %s149_s19, %s149_s19 }
  0x1d   :  { %vm77_vm1 = vcmp.lt.s32.totalorder %v74_v16, 4 }
  0x1e   :  { %103 = vpow2.f32 %v56_v2  ;;  %p156_p13 = por %p155_p12, %p154_p11 }
  0x20   :  { %p157_p0 = pnand %p156_p13, %p150_p10 }
  0x2b   :  { %v104_v3 = vpop.eup %103 }
  0x2c   :  { %v58_v4 = vadd.f32 1.0, %v104_v3 }
  0x2e   :  { %105 = vlog2.f32 %v58_v4 }
  0x2f   :  { %107 = vrcp.f32 %v58_v4 }
  0x3b   :  { %v106_v5 = vpop.eup %105 }
  0x3c   :  { %v108_v6 = vpop.eup %107  ;;  %v60_v7 = vmul.f32 0.6931472, %v106_v5 }
  0x3d   :  { %v68_v9 = vsub.f32 1.0, %v108_v6  ;;  %v67_v15 = vmul.f32 %v108_v6, %v108_v6 }
  0x3e   :  { %v61_v10 = vsub.f32 0.0, %v60_v7 }
  0x3f   :  { %v69_v11 = vmul.f32 %v68_v9, %v68_v9 }
  0x40   :  { %v62_v13 = vmax.f32 %v61_v10, -100.0  ;;  %v63_v14 = vsub.f32 %v61_v10, %v52_v0 }
  0x42   :  { %v64_v17 = vmax.f32 %v63_v14, -100.0  ;;  %v70_v18 = vmul.f32 %v69_v11, %v62_v13 }
  0x44   :  { %v71_v19 = vmul.f32 %v67_v15, %v64_v17 }
  0x46   :  { %v72_v20 = vsel %vm54_vm0, %v70_v18, %v71_v19 }
  0x47   :  { %v78_v21 = vsel %vm77_vm1, %v72_v20, 0.0 }
  0x48   :  { %82 = vst [vmem:[#allocation7] sm:$0xff] %v78_v21 }
  0x49   :  { %160 = shalt.err (!%p157_p0)
}
  0x4a   :  { %92 = dma.vmem_to_hbm [thread:$0]  %s90_s1, 128, %s204_s2, [#allocation4]  }
  0x4b   :  { %173 = dma.done.wait [#allocation4], 128  }
  0x4c   :  { %174 = vsyncadd [#allocation4], 4294967168 }
  0x4d   :  { %96 = vsyncpa [#allocation3], 1 }
  0x4e   :  { %97 = vsyncpa [#allocation6], 1 }
  0x4f   :  { %98 = vsyncpa [#allocation4], 1 }

</bundles_post_ra>
